<compile_context>
chip_gen: v7x
topology: tpu7x:2x2x1
jax: 0.10.0
libtpu: 0.0.40
codegen_flags: <defaults>
</compile_context>

<pallas_src>
import jax
import jax.numpy as jnp
from jax.experimental import pallas as pl
from jax.experimental.pallas import tpu as pltpu

N_STATES = 3
N_ACTIONS = 3
HIDDEN = 10
TILE_B = 512  # batch tile on the lane axis (multiple of 128)


def _net_kernel(x_ref, w1_ref, b1_ref, w2_ref, b2_ref, o_ref):
    # x_ref : (N_STATES, TILE_B) VMEM, batch on lanes
    # w1_ref: (HIDDEN, N_STATES) SMEM   b1_ref: (HIDDEN,)   SMEM
    # w2_ref: (N_ACTIONS, HIDDEN) SMEM  b2_ref: (N_ACTIONS,) SMEM
    # o_ref : (N_ACTIONS, TILE_B) VMEM (lane-dense output)
    x = x_ref[...]  # (N_STATES, TILE_B) f32

    # fc1 + ReLU: unrolled K=3 scalar*vector FMAs on the VPU (MXU at K=3 would
    # run at <3% utilization and only add push/pop latency).
    h_rows = []
    for j in range(HIDDEN):
        acc = x[0:1, :] * w1_ref[j, 0]
        for k in range(1, N_STATES):
            acc = acc + x[k:k + 1, :] * w1_ref[j, k]
        h_rows.append(jnp.maximum(acc + b1_ref[j], 0.0))

    # dropout: identity (eval-mode semantics)
    # TODO(synk): training-mode stochastic dropout not emitted (eval semantics).

    # out layer: unrolled K=10 VPU FMAs.
    logit_rows = []
    for a in range(N_ACTIONS):
        acc = h_rows[0] * w2_ref[a, 0]
        for j in range(1, HIDDEN):
            acc = acc + h_rows[j] * w2_ref[a, j]
        logit_rows.append(acc + b2_ref[a])

    # log_softmax across the N_ACTIONS rows: pure VPU maximum/add over sublane
    # slices (no XLU cross-lane reduction); exp/log stay on the EUP.
    m = logit_rows[0]
    for r in logit_rows[1:]:
        m = jnp.maximum(m, r)
    s = jnp.exp(logit_rows[0] - m)
    for r in logit_rows[1:]:
        s = s + jnp.exp(r - m)
    lse = m + jnp.log(s)

    o_ref[...] = jnp.concatenate([r - lse for r in logit_rows], axis=0)


def net_forward(x, w1, b1, w2, b2, *, tile_b=TILE_B):
    """x: (B, N_STATES) float32. Returns (B, N_ACTIONS) log-probabilities.

    Weights use PyTorch orientation: w1 (HIDDEN, N_STATES), w2 (N_ACTIONS, HIDDEN),
    biases 1-D.
    """
    B = x.shape[0]
    b_pad = pl.cdiv(B, tile_b) * tile_b
    num_tiles = b_pad // tile_b

    # Transpose so batch lands on the lane axis; zero-pad batch to the tile size.
    x_t = jnp.pad(x.astype(jnp.float32).T, ((0, 0), (0, b_pad - B)))

    cost = pl.CostEstimate(
        flops=2 * b_pad * (N_STATES * HIDDEN + HIDDEN * N_ACTIONS),
        transcendentals=(N_ACTIONS + 1) * b_pad,
        bytes_accessed=4 * (b_pad * (N_STATES + N_ACTIONS)
                            + HIDDEN * N_STATES + HIDDEN
                            + N_ACTIONS * HIDDEN + N_ACTIONS),
    )

    smem = pl.BlockSpec(memory_space=pltpu.MemorySpace.SMEM)
    out_t = pl.pallas_call(
        _net_kernel,
        out_shape=jax.ShapeDtypeStruct((N_ACTIONS, b_pad), jnp.float32),
        grid=(num_tiles,),
        in_specs=[
            pl.BlockSpec((N_STATES, tile_b), lambda i: (0, i)),  # x tile (lane-dense)
            smem,  # w1 (tiny, resident in SMEM)
            smem,  # b1
            smem,  # w2
            smem,  # b2
        ],
        out_specs=pl.BlockSpec((N_ACTIONS, tile_b), lambda i: (0, i)),
        compiler_params=pltpu.CompilerParams(
            dimension_semantics=("parallel",)),
        cost_estimate=cost,
    )(x_t, w1, b1, w2, b2)

    # Drop padded batch columns, return PyTorch (B, N_ACTIONS) layout.
    return out_t[:, :B].T


def init_params(key):
    """Deterministic init mimicking PyTorch Linear default (U[-1/sqrt(fan_in), +])."""
    k1, k2, k3, k4 = jax.random.split(key, 4)
    bound1 = 1.0 / jnp.sqrt(jnp.float32(N_STATES))
    bound2 = 1.0 / jnp.sqrt(jnp.float32(HIDDEN))
    # PyTorch orientation: (out_features, in_features)
    w1 = jax.random.uniform(k1, (HIDDEN, N_STATES), jnp.float32, -bound1, bound1)
    b1 = jax.random.uniform(k2, (HIDDEN,), jnp.float32, -bound1, bound1)
    w2 = jax.random.uniform(k3, (N_ACTIONS, HIDDEN), jnp.float32, -bound2, bound2)
    b2 = jax.random.uniform(k4, (N_ACTIONS,), jnp.float32, -bound2, bound2)
    return w1, b1, w2, b2


def _reference(x, w1, b1, w2, b2):
    h = jnp.maximum(x @ w1.T + b1, 0.0)
    logits = h @ w2.T + b2
    return jax.nn.log_softmax(logits, axis=1)


if __name__ == "__main__":
    key = jax.random.PRNGKey(0)
    kx, kp = jax.random.split(key)
    B = 8
    x = jax.random.normal(kx, (B, N_STATES), jnp.float32)
    w1, b1, w2, b2 = init_params(kp)

    out = net_forward(x, w1, b1, w2, b2)
    out = jax.block_until_ready(out)

    ref = _reference(x, w1, b1, w2, b2)
    assert out.shape == (B, N_ACTIONS)
    assert jnp.allclose(out, ref, atol=1e-5, rtol=1e-5), "mismatch vs reference"

    print("KERNEL_OK")
</pallas_src>

<mosaic_0001>
module attributes {stable_mosaic.version = 11 : i64} {
  func.func @_net_kernel(%arg0: i32, %arg1: memref<3x512xf32, #tpu.memory_space<vmem>>, %arg2: memref<10x3xf32, #tpu.memory_space<smem>>, %arg3: memref<10xf32, #tpu.memory_space<smem>>, %arg4: memref<3x10xf32, #tpu.memory_space<smem>>, %arg5: memref<3xf32, #tpu.memory_space<smem>>, %arg6: memref<3x512xf32, #tpu.memory_space<vmem>>) attributes {dimension_semantics = [#tpu.dimension_semantics<parallel>], iteration_bounds = array<i64: 1>, scalar_prefetch = 0 : i64, scratch_operands = 0 : i64, tpu.core_type = #tpu.core_type<tc>, window_params = [{transform_indices = @transform_0, window_bounds = array<i64: 3, 512>}, {transform_indices = @transform_1, window_bounds = array<i64: 10, 3>}, {transform_indices = @transform_2, window_bounds = array<i64: 10>}, {transform_indices = @transform_3, window_bounds = array<i64: 3, 10>}, {transform_indices = @transform_4, window_bounds = array<i64: 3>}, {transform_indices = @transform_5, window_bounds = array<i64: 3, 512>}]} {
    %c0 = arith.constant 0 : index
    %c0_0 = arith.constant 0 : index
    %0 = vector.load %arg1[%c0, %c0_0] : memref<3x512xf32, #tpu.memory_space<vmem>>, vector<3x512xf32>
    %1 = vector.extract_strided_slice %0 {offsets = [0, 0], sizes = [1, 512], strides = [1, 1]} : vector<3x512xf32> to vector<1x512xf32>
    %c0_1 = arith.constant 0 : index
    %c0_2 = arith.constant 0 : index
    %2 = memref.load %arg2[%c0_1, %c0_2] : memref<10x3xf32, #tpu.memory_space<smem>>
    %3 = vector.broadcast %2 : f32 to vector<1x512xf32>
    %4 = arith.mulf %1, %3 : vector<1x512xf32>
    %5 = vector.extract_strided_slice %0 {offsets = [1, 0], sizes = [1, 512], strides = [1, 1]} : vector<3x512xf32> to vector<1x512xf32>
    %c0_3 = arith.constant 0 : index
    %c1 = arith.constant 1 : index
    %6 = memref.load %arg2[%c0_3, %c1] : memref<10x3xf32, #tpu.memory_space<smem>>
    %7 = vector.broadcast %6 : f32 to vector<1x512xf32>
    %8 = arith.mulf %5, %7 : vector<1x512xf32>
    %9 = arith.addf %4, %8 : vector<1x512xf32>
    %10 = vector.extract_strided_slice %0 {offsets = [2, 0], sizes = [1, 512], strides = [1, 1]} : vector<3x512xf32> to vector<1x512xf32>
    %c0_4 = arith.constant 0 : index
    %c2 = arith.constant 2 : index
    %11 = memref.load %arg2[%c0_4, %c2] : memref<10x3xf32, #tpu.memory_space<smem>>
    %12 = vector.broadcast %11 : f32 to vector<1x512xf32>
    %13 = arith.mulf %10, %12 : vector<1x512xf32>
    %14 = arith.addf %9, %13 : vector<1x512xf32>
    %c0_5 = arith.constant 0 : index
    %15 = memref.load %arg3[%c0_5] : memref<10xf32, #tpu.memory_space<smem>>
    %16 = vector.broadcast %15 : f32 to vector<1x512xf32>
    %17 = arith.addf %14, %16 : vector<1x512xf32>
    %cst = arith.constant 0.000000e+00 : f32
    %18 = vector.broadcast %cst : f32 to vector<1x512xf32>
    %19 = arith.maximumf %17, %18 : vector<1x512xf32>
    %20 = vector.extract_strided_slice %0 {offsets = [0, 0], sizes = [1, 512], strides = [1, 1]} : vector<3x512xf32> to vector<1x512xf32>
    %c1_6 = arith.constant 1 : index
    %c0_7 = arith.constant 0 : index
    %21 = memref.load %arg2[%c1_6, %c0_7] : memref<10x3xf32, #tpu.memory_space<smem>>
    %22 = vector.broadcast %21 : f32 to vector<1x512xf32>
    %23 = arith.mulf %20, %22 : vector<1x512xf32>
    %24 = vector.extract_strided_slice %0 {offsets = [1, 0], sizes = [1, 512], strides = [1, 1]} : vector<3x512xf32> to vector<1x512xf32>
    %c1_8 = arith.constant 1 : index
    %c1_9 = arith.constant 1 : index
    %25 = memref.load %arg2[%c1_8, %c1_9] : memref<10x3xf32, #tpu.memory_space<smem>>
    %26 = vector.broadcast %25 : f32 to vector<1x512xf32>
    %27 = arith.mulf %24, %26 : vector<1x512xf32>
    %28 = arith.addf %23, %27 : vector<1x512xf32>
    %29 = vector.extract_strided_slice %0 {offsets = [2, 0], sizes = [1, 512], strides = [1, 1]} : vector<3x512xf32> to vector<1x512xf32>
    %c1_10 = arith.constant 1 : index
    %c2_11 = arith.constant 2 : index
    %30 = memref.load %arg2[%c1_10, %c2_11] : memref<10x3xf32, #tpu.memory_space<smem>>
    %31 = vector.broadcast %30 : f32 to vector<1x512xf32>
    %32 = arith.mulf %29, %31 : vector<1x512xf32>
    %33 = arith.addf %28, %32 : vector<1x512xf32>
    %c1_12 = arith.constant 1 : index
    %34 = memref.load %arg3[%c1_12] : memref<10xf32, #tpu.memory_space<smem>>
    %35 = vector.broadcast %34 : f32 to vector<1x512xf32>
    %36 = arith.addf %33, %35 : vector<1x512xf32>
    %cst_13 = arith.constant 0.000000e+00 : f32
    %37 = vector.broadcast %cst_13 : f32 to vector<1x512xf32>
    %38 = arith.maximumf %36, %37 : vector<1x512xf32>
    %39 = vector.extract_strided_slice %0 {offsets = [0, 0], sizes = [1, 512], strides = [1, 1]} : vector<3x512xf32> to vector<1x512xf32>
    %c2_14 = arith.constant 2 : index
    %c0_15 = arith.constant 0 : index
    %40 = memref.load %arg2[%c2_14, %c0_15] : memref<10x3xf32, #tpu.memory_space<smem>>
    %41 = vector.broadcast %40 : f32 to vector<1x512xf32>
    %42 = arith.mulf %39, %41 : vector<1x512xf32>
    %43 = vector.extract_strided_slice %0 {offsets = [1, 0], sizes = [1, 512], strides = [1, 1]} : vector<3x512xf32> to vector<1x512xf32>
    %c2_16 = arith.constant 2 : index
    %c1_17 = arith.constant 1 : index
    %44 = memref.load %arg2[%c2_16, %c1_17] : memref<10x3xf32, #tpu.memory_space<smem>>
    %45 = vector.broadcast %44 : f32 to vector<1x512xf32>
    %46 = arith.mulf %43, %45 : vector<1x512xf32>
    %47 = arith.addf %42, %46 : vector<1x512xf32>
    %48 = vector.extract_strided_slice %0 {offsets = [2, 0], sizes = [1, 512], strides = [1, 1]} : vector<3x512xf32> to vector<1x512xf32>
    %c2_18 = arith.constant 2 : index
    %c2_19 = arith.constant 2 : index
    %49 = memref.load %arg2[%c2_18, %c2_19] : memref<10x3xf32, #tpu.memory_space<smem>>
    %50 = vector.broadcast %49 : f32 to vector<1x512xf32>
    %51 = arith.mulf %48, %50 : vector<1x512xf32>
    %52 = arith.addf %47, %51 : vector<1x512xf32>
    %c2_20 = arith.constant 2 : index
    %53 = memref.load %arg3[%c2_20] : memref<10xf32, #tpu.memory_space<smem>>
    %54 = vector.broadcast %53 : f32 to vector<1x512xf32>
    %55 = arith.addf %52, %54 : vector<1x512xf32>
    %cst_21 = arith.constant 0.000000e+00 : f32
    %56 = vector.broadcast %cst_21 : f32 to vector<1x512xf32>
    %57 = arith.maximumf %55, %56 : vector<1x512xf32>
    %58 = vector.extract_strided_slice %0 {offsets = [0, 0], sizes = [1, 512], strides = [1, 1]} : vector<3x512xf32> to vector<1x512xf32>
    %c3 = arith.constant 3 : index
    %c0_22 = arith.constant 0 : index
    %59 = memref.load %arg2[%c3, %c0_22] : memref<10x3xf32, #tpu.memory_space<smem>>
    %60 = vector.broadcast %59 : f32 to vector<1x512xf32>
    %61 = arith.mulf %58, %60 : vector<1x512xf32>
    %62 = vector.extract_strided_slice %0 {offsets = [1, 0], sizes = [1, 512], strides = [1, 1]} : vector<3x512xf32> to vector<1x512xf32>
    %c3_23 = arith.constant 3 : index
    %c1_24 = arith.constant 1 : index
    %63 = memref.load %arg2[%c3_23, %c1_24] : memref<10x3xf32, #tpu.memory_space<smem>>
    %64 = vector.broadcast %63 : f32 to vector<1x512xf32>
    %65 = arith.mulf %62, %64 : vector<1x512xf32>
    %66 = arith.addf %61, %65 : vector<1x512xf32>
    %67 = vector.extract_strided_slice %0 {offsets = [2, 0], sizes = [1, 512], strides = [1, 1]} : vector<3x512xf32> to vector<1x512xf32>
    %c3_25 = arith.constant 3 : index
    %c2_26 = arith.constant 2 : index
    %68 = memref.load %arg2[%c3_25, %c2_26] : memref<10x3xf32, #tpu.memory_space<smem>>
    %69 = vector.broadcast %68 : f32 to vector<1x512xf32>
    %70 = arith.mulf %67, %69 : vector<1x512xf32>
    %71 = arith.addf %66, %70 : vector<1x512xf32>
    %c3_27 = arith.constant 3 : index
    %72 = memref.load %arg3[%c3_27] : memref<10xf32, #tpu.memory_space<smem>>
    %73 = vector.broadcast %72 : f32 to vector<1x512xf32>
    %74 = arith.addf %71, %73 : vector<1x512xf32>
    %cst_28 = arith.constant 0.000000e+00 : f32
    %75 = vector.broadcast %cst_28 : f32 to vector<1x512xf32>
    %76 = arith.maximumf %74, %75 : vector<1x512xf32>
    %77 = vector.extract_strided_slice %0 {offsets = [0, 0], sizes = [1, 512], strides = [1, 1]} : vector<3x512xf32> to vector<1x512xf32>
    %c4 = arith.constant 4 : index
    %c0_29 = arith.constant 0 : index
    %78 = memref.load %arg2[%c4, %c0_29] : memref<10x3xf32, #tpu.memory_space<smem>>
    %79 = vector.broadcast %78 : f32 to vector<1x512xf32>
    %80 = arith.mulf %77, %79 : vector<1x512xf32>
    %81 = vector.extract_strided_slice %0 {offsets = [1, 0], sizes = [1, 512], strides = [1, 1]} : vector<3x512xf32> to vector<1x512xf32>
    %c4_30 = arith.constant 4 : index
    %c1_31 = arith.constant 1 : index
    %82 = memref.load %arg2[%c4_30, %c1_31] : memref<10x3xf32, #tpu.memory_space<smem>>
    %83 = vector.broadcast %82 : f32 to vector<1x512xf32>
    %84 = arith.mulf %81, %83 : vector<1x512xf32>
    %85 = arith.addf %80, %84 : vector<1x512xf32>
    %86 = vector.extract_strided_slice %0 {offsets = [2, 0], sizes = [1, 512], strides = [1, 1]} : vector<3x512xf32> to vector<1x512xf32>
    %c4_32 = arith.constant 4 : index
    %c2_33 = arith.constant 2 : index
    %87 = memref.load %arg2[%c4_32, %c2_33] : memref<10x3xf32, #tpu.memory_space<smem>>
    %88 = vector.broadcast %87 : f32 to vector<1x512xf32>
    %89 = arith.mulf %86, %88 : vector<1x512xf32>
    %90 = arith.addf %85, %89 : vector<1x512xf32>
    %c4_34 = arith.constant 4 : index
    %91 = memref.load %arg3[%c4_34] : memref<10xf32, #tpu.memory_space<smem>>
    %92 = vector.broadcast %91 : f32 to vector<1x512xf32>
    %93 = arith.addf %90, %92 : vector<1x512xf32>
    %cst_35 = arith.constant 0.000000e+00 : f32
    %94 = vector.broadcast %cst_35 : f32 to vector<1x512xf32>
    %95 = arith.maximumf %93, %94 : vector<1x512xf32>
    %96 = vector.extract_strided_slice %0 {offsets = [0, 0], sizes = [1, 512], strides = [1, 1]} : vector<3x512xf32> to vector<1x512xf32>
    %c5 = arith.constant 5 : index
    %c0_36 = arith.constant 0 : index
    %97 = memref.load %arg2[%c5, %c0_36] : memref<10x3xf32, #tpu.memory_space<smem>>
    %98 = vector.broadcast %97 : f32 to vector<1x512xf32>
    %99 = arith.mulf %96, %98 : vector<1x512xf32>
    %100 = vector.extract_strided_slice %0 {offsets = [1, 0], sizes = [1, 512], strides = [1, 1]} : vector<3x512xf32> to vector<1x512xf32>
    %c5_37 = arith.constant 5 : index
    %c1_38 = arith.constant 1 : index
    %101 = memref.load %arg2[%c5_37, %c1_38] : memref<10x3xf32, #tpu.memory_space<smem>>
    %102 = vector.broadcast %101 : f32 to vector<1x512xf32>
    %103 = arith.mulf %100, %102 : vector<1x512xf32>
    %104 = arith.addf %99, %103 : vector<1x512xf32>
    %105 = vector.extract_strided_slice %0 {offsets = [2, 0], sizes = [1, 512], strides = [1, 1]} : vector<3x512xf32> to vector<1x512xf32>
    %c5_39 = arith.constant 5 : index
    %c2_40 = arith.constant 2 : index
    %106 = memref.load %arg2[%c5_39, %c2_40] : memref<10x3xf32, #tpu.memory_space<smem>>
    %107 = vector.broadcast %106 : f32 to vector<1x512xf32>
    %108 = arith.mulf %105, %107 : vector<1x512xf32>
    %109 = arith.addf %104, %108 : vector<1x512xf32>
    %c5_41 = arith.constant 5 : index
    %110 = memref.load %arg3[%c5_41] : memref<10xf32, #tpu.memory_space<smem>>
    %111 = vector.broadcast %110 : f32 to vector<1x512xf32>
    %112 = arith.addf %109, %111 : vector<1x512xf32>
    %cst_42 = arith.constant 0.000000e+00 : f32
    %113 = vector.broadcast %cst_42 : f32 to vector<1x512xf32>
    %114 = arith.maximumf %112, %113 : vector<1x512xf32>
    %115 = vector.extract_strided_slice %0 {offsets = [0, 0], sizes = [1, 512], strides = [1, 1]} : vector<3x512xf32> to vector<1x512xf32>
    %c6 = arith.constant 6 : index
    %c0_43 = arith.constant 0 : index
    %116 = memref.load %arg2[%c6, %c0_43] : memref<10x3xf32, #tpu.memory_space<smem>>
    %117 = vector.broadcast %116 : f32 to vector<1x512xf32>
    %118 = arith.mulf %115, %117 : vector<1x512xf32>
    %119 = vector.extract_strided_slice %0 {offsets = [1, 0], sizes = [1, 512], strides = [1, 1]} : vector<3x512xf32> to vector<1x512xf32>
    %c6_44 = arith.constant 6 : index
    %c1_45 = arith.constant 1 : index
    %120 = memref.load %arg2[%c6_44, %c1_45] : memref<10x3xf32, #tpu.memory_space<smem>>
    %121 = vector.broadcast %120 : f32 to vector<1x512xf32>
    %122 = arith.mulf %119, %121 : vector<1x512xf32>
    %123 = arith.addf %118, %122 : vector<1x512xf32>
    %124 = vector.extract_strided_slice %0 {offsets = [2, 0], sizes = [1, 512], strides = [1, 1]} : vector<3x512xf32> to vector<1x512xf32>
    %c6_46 = arith.constant 6 : index
    %c2_47 = arith.constant 2 : index
    %125 = memref.load %arg2[%c6_46, %c2_47] : memref<10x3xf32, #tpu.memory_space<smem>>
    %126 = vector.broadcast %125 : f32 to vector<1x512xf32>
    %127 = arith.mulf %124, %126 : vector<1x512xf32>
    %128 = arith.addf %123, %127 : vector<1x512xf32>
    %c6_48 = arith.constant 6 : index
    %129 = memref.load %arg3[%c6_48] : memref<10xf32, #tpu.memory_space<smem>>
    %130 = vector.broadcast %129 : f32 to vector<1x512xf32>
    %131 = arith.addf %128, %130 : vector<1x512xf32>
    %cst_49 = arith.constant 0.000000e+00 : f32
    %132 = vector.broadcast %cst_49 : f32 to vector<1x512xf32>
    %133 = arith.maximumf %131, %132 : vector<1x512xf32>
    %134 = vector.extract_strided_slice %0 {offsets = [0, 0], sizes = [1, 512], strides = [1, 1]} : vector<3x512xf32> to vector<1x512xf32>
    %c7 = arith.constant 7 : index
    %c0_50 = arith.constant 0 : index
    %135 = memref.load %arg2[%c7, %c0_50] : memref<10x3xf32, #tpu.memory_space<smem>>
    %136 = vector.broadcast %135 : f32 to vector<1x512xf32>
    %137 = arith.mulf %134, %136 : vector<1x512xf32>
    %138 = vector.extract_strided_slice %0 {offsets = [1, 0], sizes = [1, 512], strides = [1, 1]} : vector<3x512xf32> to vector<1x512xf32>
    %c7_51 = arith.constant 7 : index
    %c1_52 = arith.constant 1 : index
    %139 = memref.load %arg2[%c7_51, %c1_52] : memref<10x3xf32, #tpu.memory_space<smem>>
    %140 = vector.broadcast %139 : f32 to vector<1x512xf32>
    %141 = arith.mulf %138, %140 : vector<1x512xf32>
    %142 = arith.addf %137, %141 : vector<1x512xf32>
    %143 = vector.extract_strided_slice %0 {offsets = [2, 0], sizes = [1, 512], strides = [1, 1]} : vector<3x512xf32> to vector<1x512xf32>
    %c7_53 = arith.constant 7 : index
    %c2_54 = arith.constant 2 : index
    %144 = memref.load %arg2[%c7_53, %c2_54] : memref<10x3xf32, #tpu.memory_space<smem>>
    %145 = vector.broadcast %144 : f32 to vector<1x512xf32>
    %146 = arith.mulf %143, %145 : vector<1x512xf32>
    %147 = arith.addf %142, %146 : vector<1x512xf32>
    %c7_55 = arith.constant 7 : index
    %148 = memref.load %arg3[%c7_55] : memref<10xf32, #tpu.memory_space<smem>>
    %149 = vector.broadcast %148 : f32 to vector<1x512xf32>
    %150 = arith.addf %147, %149 : vector<1x512xf32>
    %cst_56 = arith.constant 0.000000e+00 : f32
    %151 = vector.broadcast %cst_56 : f32 to vector<1x512xf32>
    %152 = arith.maximumf %150, %151 : vector<1x512xf32>
    %153 = vector.extract_strided_slice %0 {offsets = [0, 0], sizes = [1, 512], strides = [1, 1]} : vector<3x512xf32> to vector<1x512xf32>
    %c8 = arith.constant 8 : index
    %c0_57 = arith.constant 0 : index
    %154 = memref.load %arg2[%c8, %c0_57] : memref<10x3xf32, #tpu.memory_space<smem>>
    %155 = vector.broadcast %154 : f32 to vector<1x512xf32>
    %156 = arith.mulf %153, %155 : vector<1x512xf32>
    %157 = vector.extract_strided_slice %0 {offsets = [1, 0], sizes = [1, 512], strides = [1, 1]} : vector<3x512xf32> to vector<1x512xf32>
    %c8_58 = arith.constant 8 : index
    %c1_59 = arith.constant 1 : index
    %158 = memref.load %arg2[%c8_58, %c1_59] : memref<10x3xf32, #tpu.memory_space<smem>>
    %159 = vector.broadcast %158 : f32 to vector<1x512xf32>
    %160 = arith.mulf %157, %159 : vector<1x512xf32>
    %161 = arith.addf %156, %160 : vector<1x512xf32>
    %162 = vector.extract_strided_slice %0 {offsets = [2, 0], sizes = [1, 512], strides = [1, 1]} : vector<3x512xf32> to vector<1x512xf32>
    %c8_60 = arith.constant 8 : index
    %c2_61 = arith.constant 2 : index
    %163 = memref.load %arg2[%c8_60, %c2_61] : memref<10x3xf32, #tpu.memory_space<smem>>
    %164 = vector.broadcast %163 : f32 to vector<1x512xf32>
    %165 = arith.mulf %162, %164 : vector<1x512xf32>
    %166 = arith.addf %161, %165 : vector<1x512xf32>
    %c8_62 = arith.constant 8 : index
    %167 = memref.load %arg3[%c8_62] : memref<10xf32, #tpu.memory_space<smem>>
    %168 = vector.broadcast %167 : f32 to vector<1x512xf32>
    %169 = arith.addf %166, %168 : vector<1x512xf32>
    %cst_63 = arith.constant 0.000000e+00 : f32
    %170 = vector.broadcast %cst_63 : f32 to vector<1x512xf32>
    %171 = arith.maximumf %169, %170 : vector<1x512xf32>
    %172 = vector.extract_strided_slice %0 {offsets = [0, 0], sizes = [1, 512], strides = [1, 1]} : vector<3x512xf32> to vector<1x512xf32>
    %c9 = arith.constant 9 : index
    %c0_64 = arith.constant 0 : index
    %173 = memref.load %arg2[%c9, %c0_64] : memref<10x3xf32, #tpu.memory_space<smem>>
    %174 = vector.broadcast %173 : f32 to vector<1x512xf32>
    %175 = arith.mulf %172, %174 : vector<1x512xf32>
    %176 = vector.extract_strided_slice %0 {offsets = [1, 0], sizes = [1, 512], strides = [1, 1]} : vector<3x512xf32> to vector<1x512xf32>
    %c9_65 = arith.constant 9 : index
    %c1_66 = arith.constant 1 : index
    %177 = memref.load %arg2[%c9_65, %c1_66] : memref<10x3xf32, #tpu.memory_space<smem>>
    %178 = vector.broadcast %177 : f32 to vector<1x512xf32>
    %179 = arith.mulf %176, %178 : vector<1x512xf32>
    %180 = arith.addf %175, %179 : vector<1x512xf32>
    %181 = vector.extract_strided_slice %0 {offsets = [2, 0], sizes = [1, 512], strides = [1, 1]} : vector<3x512xf32> to vector<1x512xf32>
    %c9_67 = arith.constant 9 : index
    %c2_68 = arith.constant 2 : index
    %182 = memref.load %arg2[%c9_67, %c2_68] : memref<10x3xf32, #tpu.memory_space<smem>>
    %183 = vector.broadcast %182 : f32 to vector<1x512xf32>
    %184 = arith.mulf %181, %183 : vector<1x512xf32>
    %185 = arith.addf %180, %184 : vector<1x512xf32>
    %c9_69 = arith.constant 9 : index
    %186 = memref.load %arg3[%c9_69] : memref<10xf32, #tpu.memory_space<smem>>
    %187 = vector.broadcast %186 : f32 to vector<1x512xf32>
    %188 = arith.addf %185, %187 : vector<1x512xf32>
    %cst_70 = arith.constant 0.000000e+00 : f32
    %189 = vector.broadcast %cst_70 : f32 to vector<1x512xf32>
    %190 = arith.maximumf %188, %189 : vector<1x512xf32>
    %c0_71 = arith.constant 0 : index
    %c0_72 = arith.constant 0 : index
    %191 = memref.load %arg4[%c0_71, %c0_72] : memref<3x10xf32, #tpu.memory_space<smem>>
    %192 = vector.broadcast %191 : f32 to vector<1x512xf32>
    %193 = arith.mulf %19, %192 : vector<1x512xf32>
    %c0_73 = arith.constant 0 : index
    %c1_74 = arith.constant 1 : index
    %194 = memref.load %arg4[%c0_73, %c1_74] : memref<3x10xf32, #tpu.memory_space<smem>>
    %195 = vector.broadcast %194 : f32 to vector<1x512xf32>
    %196 = arith.mulf %38, %195 : vector<1x512xf32>
    %197 = arith.addf %193, %196 : vector<1x512xf32>
    %c0_75 = arith.constant 0 : index
    %c2_76 = arith.constant 2 : index
    %198 = memref.load %arg4[%c0_75, %c2_76] : memref<3x10xf32, #tpu.memory_space<smem>>
    %199 = vector.broadcast %198 : f32 to vector<1x512xf32>
    %200 = arith.mulf %57, %199 : vector<1x512xf32>
    %201 = arith.addf %197, %200 : vector<1x512xf32>
    %c0_77 = arith.constant 0 : index
    %c3_78 = arith.constant 3 : index
    %202 = memref.load %arg4[%c0_77, %c3_78] : memref<3x10xf32, #tpu.memory_space<smem>>
    %203 = vector.broadcast %202 : f32 to vector<1x512xf32>
    %204 = arith.mulf %76, %203 : vector<1x512xf32>
    %205 = arith.addf %201, %204 : vector<1x512xf32>
    %c0_79 = arith.constant 0 : index
    %c4_80 = arith.constant 4 : index
    %206 = memref.load %arg4[%c0_79, %c4_80] : memref<3x10xf32, #tpu.memory_space<smem>>
    %207 = vector.broadcast %206 : f32 to vector<1x512xf32>
    %208 = arith.mulf %95, %207 : vector<1x512xf32>
    %209 = arith.addf %205, %208 : vector<1x512xf32>
    %c0_81 = arith.constant 0 : index
    %c5_82 = arith.constant 5 : index
    %210 = memref.load %arg4[%c0_81, %c5_82] : memref<3x10xf32, #tpu.memory_space<smem>>
    %211 = vector.broadcast %210 : f32 to vector<1x512xf32>
    %212 = arith.mulf %114, %211 : vector<1x512xf32>
    %213 = arith.addf %209, %212 : vector<1x512xf32>
    %c0_83 = arith.constant 0 : index
    %c6_84 = arith.constant 6 : index
    %214 = memref.load %arg4[%c0_83, %c6_84] : memref<3x10xf32, #tpu.memory_space<smem>>
    %215 = vector.broadcast %214 : f32 to vector<1x512xf32>
    %216 = arith.mulf %133, %215 : vector<1x512xf32>
    %217 = arith.addf %213, %216 : vector<1x512xf32>
    %c0_85 = arith.constant 0 : index
    %c7_86 = arith.constant 7 : index
    %218 = memref.load %arg4[%c0_85, %c7_86] : memref<3x10xf32, #tpu.memory_space<smem>>
    %219 = vector.broadcast %218 : f32 to vector<1x512xf32>
    %220 = arith.mulf %152, %219 : vector<1x512xf32>
    %221 = arith.addf %217, %220 : vector<1x512xf32>
    %c0_87 = arith.constant 0 : index
    %c8_88 = arith.constant 8 : index
    %222 = memref.load %arg4[%c0_87, %c8_88] : memref<3x10xf32, #tpu.memory_space<smem>>
    %223 = vector.broadcast %222 : f32 to vector<1x512xf32>
    %224 = arith.mulf %171, %223 : vector<1x512xf32>
    %225 = arith.addf %221, %224 : vector<1x512xf32>
    %c0_89 = arith.constant 0 : index
    %c9_90 = arith.constant 9 : index
    %226 = memref.load %arg4[%c0_89, %c9_90] : memref<3x10xf32, #tpu.memory_space<smem>>
    %227 = vector.broadcast %226 : f32 to vector<1x512xf32>
    %228 = arith.mulf %190, %227 : vector<1x512xf32>
    %229 = arith.addf %225, %228 : vector<1x512xf32>
    %c0_91 = arith.constant 0 : index
    %230 = memref.load %arg5[%c0_91] : memref<3xf32, #tpu.memory_space<smem>>
    %231 = vector.broadcast %230 : f32 to vector<1x512xf32>
    %232 = arith.addf %229, %231 : vector<1x512xf32>
    %c1_92 = arith.constant 1 : index
    %c0_93 = arith.constant 0 : index
    %233 = memref.load %arg4[%c1_92, %c0_93] : memref<3x10xf32, #tpu.memory_space<smem>>
    %234 = vector.broadcast %233 : f32 to vector<1x512xf32>
    %235 = arith.mulf %19, %234 : vector<1x512xf32>
    %c1_94 = arith.constant 1 : index
    %c1_95 = arith.constant 1 : index
    %236 = memref.load %arg4[%c1_94, %c1_95] : memref<3x10xf32, #tpu.memory_space<smem>>
    %237 = vector.broadcast %236 : f32 to vector<1x512xf32>
    %238 = arith.mulf %38, %237 : vector<1x512xf32>
    %239 = arith.addf %235, %238 : vector<1x512xf32>
    %c1_96 = arith.constant 1 : index
    %c2_97 = arith.constant 2 : index
    %240 = memref.load %arg4[%c1_96, %c2_97] : memref<3x10xf32, #tpu.memory_space<smem>>
    %241 = vector.broadcast %240 : f32 to vector<1x512xf32>
    %242 = arith.mulf %57, %241 : vector<1x512xf32>
    %243 = arith.addf %239, %242 : vector<1x512xf32>
    %c1_98 = arith.constant 1 : index
    %c3_99 = arith.constant 3 : index
    %244 = memref.load %arg4[%c1_98, %c3_99] : memref<3x10xf32, #tpu.memory_space<smem>>
    %245 = vector.broadcast %244 : f32 to vector<1x512xf32>
    %246 = arith.mulf %76, %245 : vector<1x512xf32>
    %247 = arith.addf %243, %246 : vector<1x512xf32>
    %c1_100 = arith.constant 1 : index
    %c4_101 = arith.constant 4 : index
    %248 = memref.load %arg4[%c1_100, %c4_101] : memref<3x10xf32, #tpu.memory_space<smem>>
    %249 = vector.broadcast %248 : f32 to vector<1x512xf32>
    %250 = arith.mulf %95, %249 : vector<1x512xf32>
    %251 = arith.addf %247, %250 : vector<1x512xf32>
    %c1_102 = arith.constant 1 : index
    %c5_103 = arith.constant 5 : index
    %252 = memref.load %arg4[%c1_102, %c5_103] : memref<3x10xf32, #tpu.memory_space<smem>>
    %253 = vector.broadcast %252 : f32 to vector<1x512xf32>
    %254 = arith.mulf %114, %253 : vector<1x512xf32>
    %255 = arith.addf %251, %254 : vector<1x512xf32>
    %c1_104 = arith.constant 1 : index
    %c6_105 = arith.constant 6 : index
    %256 = memref.load %arg4[%c1_104, %c6_105] : memref<3x10xf32, #tpu.memory_space<smem>>
    %257 = vector.broadcast %256 : f32 to vector<1x512xf32>
    %258 = arith.mulf %133, %257 : vector<1x512xf32>
    %259 = arith.addf %255, %258 : vector<1x512xf32>
    %c1_106 = arith.constant 1 : index
    %c7_107 = arith.constant 7 : index
    %260 = memref.load %arg4[%c1_106, %c7_107] : memref<3x10xf32, #tpu.memory_space<smem>>
    %261 = vector.broadcast %260 : f32 to vector<1x512xf32>
    %262 = arith.mulf %152, %261 : vector<1x512xf32>
    %263 = arith.addf %259, %262 : vector<1x512xf32>
    %c1_108 = arith.constant 1 : index
    %c8_109 = arith.constant 8 : index
    %264 = memref.load %arg4[%c1_108, %c8_109] : memref<3x10xf32, #tpu.memory_space<smem>>
    %265 = vector.broadcast %264 : f32 to vector<1x512xf32>
    %266 = arith.mulf %171, %265 : vector<1x512xf32>
    %267 = arith.addf %263, %266 : vector<1x512xf32>
    %c1_110 = arith.constant 1 : index
    %c9_111 = arith.constant 9 : index
    %268 = memref.load %arg4[%c1_110, %c9_111] : memref<3x10xf32, #tpu.memory_space<smem>>
    %269 = vector.broadcast %268 : f32 to vector<1x512xf32>
    %270 = arith.mulf %190, %269 : vector<1x512xf32>
    %271 = arith.addf %267, %270 : vector<1x512xf32>
    %c1_112 = arith.constant 1 : index
    %272 = memref.load %arg5[%c1_112] : memref<3xf32, #tpu.memory_space<smem>>
    %273 = vector.broadcast %272 : f32 to vector<1x512xf32>
    %274 = arith.addf %271, %273 : vector<1x512xf32>
    %c2_113 = arith.constant 2 : index
    %c0_114 = arith.constant 0 : index
    %275 = memref.load %arg4[%c2_113, %c0_114] : memref<3x10xf32, #tpu.memory_space<smem>>
    %276 = vector.broadcast %275 : f32 to vector<1x512xf32>
    %277 = arith.mulf %19, %276 : vector<1x512xf32>
    %c2_115 = arith.constant 2 : index
    %c1_116 = arith.constant 1 : index
    %278 = memref.load %arg4[%c2_115, %c1_116] : memref<3x10xf32, #tpu.memory_space<smem>>
    %279 = vector.broadcast %278 : f32 to vector<1x512xf32>
    %280 = arith.mulf %38, %279 : vector<1x512xf32>
    %281 = arith.addf %277, %280 : vector<1x512xf32>
    %c2_117 = arith.constant 2 : index
    %c2_118 = arith.constant 2 : index
    %282 = memref.load %arg4[%c2_117, %c2_118] : memref<3x10xf32, #tpu.memory_space<smem>>
    %283 = vector.broadcast %282 : f32 to vector<1x512xf32>
    %284 = arith.mulf %57, %283 : vector<1x512xf32>
    %285 = arith.addf %281, %284 : vector<1x512xf32>
    %c2_119 = arith.constant 2 : index
    %c3_120 = arith.constant 3 : index
    %286 = memref.load %arg4[%c2_119, %c3_120] : memref<3x10xf32, #tpu.memory_space<smem>>
    %287 = vector.broadcast %286 : f32 to vector<1x512xf32>
    %288 = arith.mulf %76, %287 : vector<1x512xf32>
    %289 = arith.addf %285, %288 : vector<1x512xf32>
    %c2_121 = arith.constant 2 : index
    %c4_122 = arith.constant 4 : index
    %290 = memref.load %arg4[%c2_121, %c4_122] : memref<3x10xf32, #tpu.memory_space<smem>>
    %291 = vector.broadcast %290 : f32 to vector<1x512xf32>
    %292 = arith.mulf %95, %291 : vector<1x512xf32>
    %293 = arith.addf %289, %292 : vector<1x512xf32>
    %c2_123 = arith.constant 2 : index
    %c5_124 = arith.constant 5 : index
    %294 = memref.load %arg4[%c2_123, %c5_124] : memref<3x10xf32, #tpu.memory_space<smem>>
    %295 = vector.broadcast %294 : f32 to vector<1x512xf32>
    %296 = arith.mulf %114, %295 : vector<1x512xf32>
    %297 = arith.addf %293, %296 : vector<1x512xf32>
    %c2_125 = arith.constant 2 : index
    %c6_126 = arith.constant 6 : index
    %298 = memref.load %arg4[%c2_125, %c6_126] : memref<3x10xf32, #tpu.memory_space<smem>>
    %299 = vector.broadcast %298 : f32 to vector<1x512xf32>
    %300 = arith.mulf %133, %299 : vector<1x512xf32>
    %301 = arith.addf %297, %300 : vector<1x512xf32>
    %c2_127 = arith.constant 2 : index
    %c7_128 = arith.constant 7 : index
    %302 = memref.load %arg4[%c2_127, %c7_128] : memref<3x10xf32, #tpu.memory_space<smem>>
    %303 = vector.broadcast %302 : f32 to vector<1x512xf32>
    %304 = arith.mulf %152, %303 : vector<1x512xf32>
    %305 = arith.addf %301, %304 : vector<1x512xf32>
    %c2_129 = arith.constant 2 : index
    %c8_130 = arith.constant 8 : index
    %306 = memref.load %arg4[%c2_129, %c8_130] : memref<3x10xf32, #tpu.memory_space<smem>>
    %307 = vector.broadcast %306 : f32 to vector<1x512xf32>
    %308 = arith.mulf %171, %307 : vector<1x512xf32>
    %309 = arith.addf %305, %308 : vector<1x512xf32>
    %c2_131 = arith.constant 2 : index
    %c9_132 = arith.constant 9 : index
    %310 = memref.load %arg4[%c2_131, %c9_132] : memref<3x10xf32, #tpu.memory_space<smem>>
    %311 = vector.broadcast %310 : f32 to vector<1x512xf32>
    %312 = arith.mulf %190, %311 : vector<1x512xf32>
    %313 = arith.addf %309, %312 : vector<1x512xf32>
    %c2_133 = arith.constant 2 : index
    %314 = memref.load %arg5[%c2_133] : memref<3xf32, #tpu.memory_space<smem>>
    %315 = vector.broadcast %314 : f32 to vector<1x512xf32>
    %316 = arith.addf %313, %315 : vector<1x512xf32>
    %317 = arith.maximumf %232, %274 : vector<1x512xf32>
    %318 = arith.maximumf %317, %316 : vector<1x512xf32>
    %319 = arith.subf %232, %318 : vector<1x512xf32>
    %320 = math.exp %319 : vector<1x512xf32>
    %321 = arith.subf %274, %318 : vector<1x512xf32>
    %322 = math.exp %321 : vector<1x512xf32>
    %323 = arith.addf %320, %322 : vector<1x512xf32>
    %324 = arith.subf %316, %318 : vector<1x512xf32>
    %325 = math.exp %324 : vector<1x512xf32>
    %326 = arith.addf %323, %325 : vector<1x512xf32>
    %327 = math.log %326 : vector<1x512xf32>
    %328 = arith.addf %318, %327 : vector<1x512xf32>
    %329 = arith.subf %232, %328 : vector<1x512xf32>
    %330 = arith.subf %274, %328 : vector<1x512xf32>
    %331 = arith.subf %316, %328 : vector<1x512xf32>
    %332 = tpu.concatenate %329, %330, %331 in 0 : vector<1x512xf32>, vector<1x512xf32>, vector<1x512xf32> -> vector<3x512xf32>
    %c0_134 = arith.constant 0 : index
    %c0_135 = arith.constant 0 : index
    %333 = vector.load %arg6[%c0_134, %c0_135] : memref<3x512xf32, #tpu.memory_space<vmem>>, vector<3x512xf32>
    tpu.vector_store %arg6[%c0_134, %c0_135], %332 {strides = array<i32>} : memref<3x512xf32, #tpu.memory_space<vmem>>, vector<3x512xf32>,
    return
  }
  func.func @transform_0(%arg0: i32) -> (i32, i32) {
    %c0_i32 = arith.constant 0 : i32
    %c0_i32_0 = arith.constant 0 : i32
    return %c0_i32, %arg0 : i32, i32
  }
  func.func @transform_1(%arg0: i32) -> (i32, i32) {
    %c0_i32 = arith.constant 0 : i32
    %c0_i32_0 = arith.constant 0 : i32
    %c0_i32_1 = arith.constant 0 : i32
    return %c0_i32, %c0_i32_0 : i32, i32
  }
  func.func @transform_2(%arg0: i32) -> i32 {
    %c0_i32 = arith.constant 0 : i32
    %c0_i32_0 = arith.constant 0 : i32
    return %c0_i32 : i32
  }
  func.func @transform_3(%arg0: i32) -> (i32, i32) {
    %c0_i32 = arith.constant 0 : i32
    %c0_i32_0 = arith.constant 0 : i32
    %c0_i32_1 = arith.constant 0 : i32
    return %c0_i32, %c0_i32_0 : i32, i32
  }
  func.func @transform_4(%arg0: i32) -> i32 {
    %c0_i32 = arith.constant 0 : i32
    %c0_i32_0 = arith.constant 0 : i32
    return %c0_i32 : i32
  }
  func.func @transform_5(%arg0: i32) -> (i32, i32) {
    %c0_i32 = arith.constant 0 : i32
    %c0_i32_0 = arith.constant 0 : i32
    return %c0_i32, %arg0 : i32, i32
  }
}

</mosaic_0001>

<bundles_post_ra>
// kernel: tpu_custom_call.1
= control target key start
LH: loop header
LB: loop body
LE: loop exit
PB: predicated region body
PF: predicated region fallthrough
CT: control target
= control target key end

     0   :  { %10 = vsyncpa [#allocation4], 0  ;;  %s1430_s0 = inlined_call_operand.vmem [shape: f32[3,512], index: 0, kind: input, shape index: {}]   ;;  %s1431_s1 = inlined_call_operand.vmem [shape: f32[10,3], index: 1, kind: input, shape index: {}]   ;;  %s1432_s2 = inlined_call_operand.vmem [shape: f32[10], index: 2, kind: input, shape index: {}]   ;;  %s1433_s3 = inlined_call_operand.vmem [shape: f32[3,10], index: 3, kind: input, shape index: {}]   ;;  %s1434_s4 = inlined_call_operand.vmem [shape: f32[3], index: 4, kind: input, shape index: {}]   ;;  %s1435_s5 = inlined_call_operand.hbm [shape: f32[3,512], index: 5, kind: output, shape index: {}]  }
   0x1   :  { %11 = vsyncpa [#allocation6], 0 }
   0x2   :  { %12 = vsyncpa [#allocation9], 0  ;;  %s34_s20 = sshll.u32 %s1432_s2, 4  ;;  %s35_s20 = int_to_ptr.vmem [resolvable:$true] %s34_s20 }
   0x3   :  { %13 = vsyncpa [#allocation3], 0  ;;  %s21_s23 = sshll.u32 %s1431_s1, 4  ;;  %s912_s24 = scalar_lea.vmem %s35_s20, 16  ;;  %s22_s23 = int_to_ptr.vmem [resolvable:$true] %s21_s23 }
   0x4   :  { %p913_p0 = scmp.ne.s32.totalorder %s35_s20, %s912_s24  ;;  %p917_p1 = scmp.lt.s32.totalorder %s35_s20, %s35_s20 }
   0x5   :  { %p918_p2 = scmp.lt.s32.totalorder %s912_s24, %s912_s24 }
   0x7   :  { %p919_p3 = por %p918_p2, %p917_p1 }
   0x9   :  { %p920_p4 = pnand %p919_p3, %p913_p0 }
   0xb   :  { %923 = shalt.err (!%p920_p4)
}
   0xc   :  { %s990_s25 = smov [#allocation5]   ;;  %s924_s26 = scalar_lea.vmem %s22_s23, 256 }
   0xd   :  { %37 = dma.vmem_to_smem %s35_s20, 16, %s990_s25, [#allocation6]  }
   0xe   :  { %p925_p5 = scmp.ne.s32.totalorder %s22_s23, %s924_s26  ;;  %p929_p6 = scmp.lt.s32.totalorder %s22_s23, %s22_s23 }
   0xf   :  { %p930_p7 = scmp.lt.s32.totalorder %s924_s26, %s924_s26 }
  0x11   :  { %p931_p8 = por %p930_p7, %p929_p6 }
  0x13   :  { %p932_p9 = pnand %p931_p8, %p925_p5 }
  0x15   :  { %935 = shalt.err (!%p932_p9)
}
  0x16   :  { %s991_s2 = smov [#allocation2]   ;;  %s992_s27 = smov 128  }
  0x17   :  { %s993_s1 = smov 8   ;;  %s44_s30 = sshll.u32 %s1433_s3, 4  ;;  %s45_s30 = int_to_ptr.vmem [resolvable:$true] %s44_s30 }
  0x18   :  { %27 = dma.vmem_to_smem %s22_s23, 256, %s991_s2, [#allocation4], %s992_s27, %s992_s27, %s993_s1  }
  0x19   :  { %s54_s8 = sshll.u32 %s1434_s4, 4  ;;  %s936_s9 = scalar_lea.vmem %s45_s30, 64  ;;  %s55_s8 = int_to_ptr.vmem [resolvable:$true] %s54_s8 }
  0x1a   :  { %p937_p10 = scmp.ne.s32.totalorder %s45_s30, %s936_s9  ;;  %p941_p11 = scmp.lt.s32.totalorder %s45_s30, %s45_s30 }
  0x1b   :  { %p942_p12 = scmp.lt.s32.totalorder %s936_s9, %s936_s9 }
  0x1d   :  { %p943_p13 = por %p942_p12, %p941_p11 }
  0x1f   :  { %p944_p0 = pnand %p943_p13, %p937_p10 }
  0x21   :  { %947 = shalt.err (!%p944_p0)
}
  0x22   :  { %s994_s10 = smov [#allocation7]   ;;  %s948_s11 = scalar_lea.vmem %s55_s8, 16 }
  0x23   :  { %47 = dma.vmem_to_smem %s45_s30, 64, %s994_s10, [#allocation6]  }
  0x24   :  { %p949_p1 = scmp.ne.s32.totalorder %s55_s8, %s948_s11  ;;  %p953_p2 = scmp.lt.s32.totalorder %s55_s8, %s55_s8 }
  0x25   :  { %p954_p3 = scmp.lt.s32.totalorder %s948_s11, %s948_s11 }
  0x27   :  { %p955_p4 = por %p954_p3, %p953_p2 }
  0x29   :  { %p956_p5 = pnand %p955_p4, %p949_p1 }
  0x2b   :  { %959 = shalt.err (!%p956_p5)
}
  0x2c   :  { %s995_s3 = smov [#allocation8]  }
  0x2d   :  { %57 = dma.vmem_to_smem %s55_s8, 16, %s995_s3, [#allocation9]  }
  0x2e   :  { %982 = dma.done.wait [#allocation4], 256  }
  0x2f   :  { %983 = vsyncadd [#allocation4], 4294967040 }
  0x30   :  { %984 = dma.done.wait [#allocation6], 80  }
  0x31   :  { %985 = vsyncadd [#allocation6], 4294967216 }
  0x32   :  { %986 = dma.done.wait [#allocation9], 16  }
  0x33   :  { %987 = vsyncadd [#allocation9], 4294967280 }
  0x34   :  { %70 = sfence }
  0x35   :  { %s73_s4 = sld [smem:[#allocation2]]  ;;  %s780_s12 = sld [smem:[#allocation2 + $0x1]]  ;;  %v1044_v0 = vld [vmem:[%s1430_s0] sm:$0x77]  ;;  %v1049_v1 = vld [vmem:[%s1430_s0 + $0x8] sm:$0x77] }
  0x36   :  { %s783_s13 = sld [smem:[#allocation2 + $0x2]]  ;;  %s786_s14 = sld [smem:[#allocation2 + $0x80]]  ;;  %vm743_vm0 = vcmask 1040384   ;;  %vm748_vm1 = vcmask 1041408  }
  0x37   :  { %s787_s15 = sld [smem:[#allocation2 + $0x81]]  ;;  %s1039_s16 = sld [smem:[#allocation2 + $0x82]] }
  0x38   :  { %s1051_s21 = sld [smem:[#allocation2 + $0x100]]  ;;  %s1057_s23 = sld [smem:[#allocation5 + $0x1]] }
  0x39   :  { %s1053_s22 = sld [smem:[#allocation5]]  ;;  %s1063_s0 = sld [smem:[#allocation2 + $0x101]] }
  0x3a   :  { %s1065_s24 = sld [smem:[#allocation2 + $0x102]]  ;;  %s1074_s25 = sld [smem:[#allocation2 + $0x180]] }
  0x3b   :  { %v74_v2 = vstv %s73_s4  ;;  %v78_v5 = vstv %s780_s12  ;;  %s1077_s26 = sld [smem:[#allocation5 + $0x2]]  ;;  %s1080_s2 = sld [smem:[#allocation2 + $0x181]] }
  0x3c   :  { %v75_v3 = vmul.f32 %v74_v2, %v1044_v0  ;;  %v76_v4 = vmul.f32 %v74_v2, %v1049_v1  ;;  %v92_v6 = vstv %s783_s13  ;;  %v79_v7 = vmul.f32 %v78_v5, %v1044_v0  ;;  %s1082_s27 = sld [smem:[#allocation2 + $0x182]]  ;;  %s1090_s1 = sld [smem:[#allocation2 + $0x200]] }
  0x3d   :  { %v80_v8 = vmul.f32 %v78_v5, %v1049_v1  ;;  %v93_v9 = vmul.f32 %v92_v6, %v1044_v0  ;;  %v94_v10 = vmul.f32 %v92_v6, %v1049_v1  ;;  %v112_v11 = vstv %s786_s14  ;;  %s1095_s28 = sld [smem:[#allocation5 + $0x3]]  ;;  %s1098_s29 = sld [smem:[#allocation2 + $0x201]] }
  0x3e   :  { %v116_v12 = vstv %s787_s15  ;;  %v130_v13 = vstv %s1039_s16  ;;  %v781_v14 = vrot.slane %v79_v7, 9  ;;  %v113_v18 = vmul.f32 %v112_v11, %v1044_v0  ;;  %s1100_s30 = sld [smem:[#allocation2 + $0x202]]  ;;  %s1103_s6 = sld [smem:[#allocation2 + $0x280]] }
  0x3f   :  { %v782_v15 = vrot.slane %v80_v8, 9  ;;  %v784_v16 = vrot.slane %v93_v9, 10  ;;  %v785_v17 = vrot.slane %v94_v10, 10  ;;  %v114_v19 = vmul.f32 %v112_v11, %v1049_v1  ;;  %s1111_s7 = sld [smem:[#allocation5 + $0x4]]  ;;  %s1119_s8 = sld [smem:[#allocation2 + $0x281]] }
  0x40   :  { %v117_v20 = vmul.f32 %v116_v12, %v1044_v0  ;;  %v118_v21 = vmul.f32 %v116_v12, %v1049_v1  ;;  %v89_v22 = vadd.f32 %v781_v14, %v75_v3  ;;  %v131_v24 = vmul.f32 %v130_v13, %v1044_v0  ;;  %s1121_s9 = sld [smem:[#allocation2 + $0x282]]  ;;  %s1129_s10 = sld [smem:[#allocation2 + $0x300]] }
  0x41   :  { %v90_v23 = vadd.f32 %v782_v15, %v76_v4  ;;  %v132_v25 = vmul.f32 %v130_v13, %v1049_v1  ;;  %v150_v28 = vstv %s1051_s21  ;;  %v106_v29 = vstv %s1053_s22  ;;  %s1142_s11 = sld [smem:[#allocation2 + $0x301]]  ;;  %s1144_s3 = sld [smem:[#allocation2 + $0x302]] }
  0x42   :  { %v788_v26 = vrot.slane %v117_v20, 9  ;;  %v789_v27 = vrot.slane %v118_v21, 9  ;;  %v791_v30 = vrot.slane %v131_v24, 10  ;;  %v103_v32 = vadd.f32 %v784_v16, %v89_v22  ;;  %s1150_s4 = sld [smem:[#allocation5 + $0x5]]  ;;  %s1152_s12 = sld [smem:[#allocation2 + $0x380]] }
  0x43   :  { %v792_v31 = vrot.slane %v132_v25, 10  ;;  %v144_v35 = vstv %s1057_s23  ;;  %v104_v36 = vadd.f32 %v785_v17, %v90_v23  ;;  %v151_v37 = vmul.f32 %v150_v28, %v1044_v0  ;;  %s1162_s13 = sld [smem:[#allocation2 + $0x381]]  ;;  %s1164_s14 = sld [smem:[#allocation2 + $0x382]] }
  0x44   :  { %v127_v33 = vadd.f32 %v788_v26, %v113_v18  ;;  %v128_v34 = vadd.f32 %v789_v27, %v114_v19  ;;  %v154_v38 = vstv %s1063_s0  ;;  %v168_v39 = vstv %s1065_s24  ;;  %s1171_s15 = sld [smem:[#allocation5 + $0x6]]  ;;  %s1176_s16 = sld [smem:[#allocation2 + $0x400]] }
  0x45   :  { %v155_v42 = vmul.f32 %v154_v38, %v1044_v0  ;;  %v156_v43 = vmul.f32 %v154_v38, %v1049_v1  ;;  %v152_v44 = vmul.f32 %v150_v28, %v1049_v1  ;;  %v169_v45 = vmul.f32 %v168_v39, %v1044_v0  ;;  %s1181_s17 = sld [smem:[#allocation5 + $0x7]]  ;;  %s1183_s18 = sld [smem:[#allocation2 + $0x401]] }
  0x46   :  { %v141_v40 = vadd.f32 %v791_v30, %v127_v33  ;;  %v142_v41 = vadd.f32 %v792_v31, %v128_v34  ;;  %v170_v46 = vmul.f32 %v168_v39, %v1049_v1  ;;  %v107_v47 = vadd.f32 %v106_v29, %v103_v32  ;;  %s1188_s19 = sld [smem:[#allocation2 + $0x402]]  ;;  %s1192_s20 = sld [smem:[#allocation2 + $0x480]] }
  0x47   :  { %v796_v48 = vrot.slane %v155_v42, 9  ;;  %v797_v49 = vrot.slane %v156_v43, 9  ;;  %v108_v50 = vadd.f32 %v106_v29, %v104_v36  ;;  %v799_v52 = vrot.slane %v169_v45, 10  ;;  %s1205_s21 = sld [smem:[#allocation2 + $0x481]]  ;;  %s1207_s22 = sld [smem:[#allocation2 + $0x482]] }
  0x48   :  { %v145_v51 = vadd.f32 %v144_v35, %v141_v40  ;;  %v188_v53 = vstv %s1074_s25  ;;  %v146_v54 = vadd.f32 %v144_v35, %v142_v41  ;;  %v800_v56 = vrot.slane %v170_v46, 10  ;;  %s1213_s23 = sld [smem:[#allocation5 + $0x8]]  ;;  %s1228_s24 = sld [smem:[#allocation7 + $0x1]] }
  0x49   :  { %v165_v55 = vadd.f32 %v796_v48, %v151_v37  ;;  %v182_v57 = vstv %s1077_s26  ;;  %v166_v58 = vadd.f32 %v797_v49, %v152_v44  ;;  %v189_v59 = vmul.f32 %v188_v53, %v1044_v0  ;;  %s1215_s0 = sld [smem:[#allocation7]]  ;;  %s1230_s25 = sld [smem:[#allocation7 + $0x2]] }
  0x4a   :  { %v192_v60 = vstv %s1080_s2  ;;  %v206_v61 = vstv %s1082_s27  ;;  %v190_v63 = vmul.f32 %v188_v53, %v1049_v1  ;;  %v1113_v4 = vmax.f32 %v107_v47, 0.0  ;;  %s1236_s26 = sld [smem:[#allocation5 + $0x9]]  ;;  %s1241_s2 = sld [smem:[#allocation7 + $0x3]] }
  0x4b   :  { %v179_v62 = vadd.f32 %v799_v52, %v165_v55  ;;  %v193_v2 = vmul.f32 %v192_v60, %v1044_v0  ;;  %v194_v3 = vmul.f32 %v192_v60, %v1049_v1  ;;  %v1115_v5 = vmax.f32 %v108_v50, 0.0  ;;  %s1243_s27 = sld [smem:[#allocation7 + $0x4]] }
  0x4c   :  { %v207_v6 = vmul.f32 %v206_v61, %v1044_v0  ;;  %v208_v7 = vmul.f32 %v206_v61, %v1049_v1  ;;  %v1123_v8 = vmax.f32 %v145_v51, 0.0  ;;  %v226_v11 = vstv %s1090_s1  ;;  %s1252_s1 = sld [smem:[#allocation7 + $0x5]] }
  0x4d   :  { %v804_v9 = vrot.slane %v193_v2, 9  ;;  %v805_v10 = vrot.slane %v194_v3, 9  ;;  %v1126_v12 = vmax.f32 %v146_v54, 0.0  ;;  %v180_v13 = vadd.f32 %v800_v56, %v166_v58 }
  0x4e   :  { %v183_v14 = vadd.f32 %v182_v57, %v179_v62  ;;  %v807_v15 = vrot.slane %v207_v6, 10  ;;  %v808_v18 = vrot.slane %v208_v7, 10  ;;  %v220_v19 = vstv %s1095_s28  ;;  %s1256_s28 = sld [smem:[#allocation7 + $0x6]] }
  0x4f   :  { %v203_v16 = vadd.f32 %v804_v9, %v189_v59  ;;  %v204_v17 = vadd.f32 %v805_v10, %v190_v63  ;;  %v227_v20 = vmul.f32 %v226_v11, %v1044_v0  ;;  %v228_v21 = vmul.f32 %v226_v11, %v1049_v1 }
  0x50   :  { %v230_v22 = vstv %s1098_s29  ;;  %v244_v23 = vstv %s1100_s30  ;;  %v264_v27 = vstv %s1103_s6  ;;  %v184_v28 = vadd.f32 %v182_v57, %v180_v13  ;;  %s1264_s29 = sld [smem:[#allocation7 + $0x7]]  ;;  %s1271_s30 = sld [smem:[#allocation7 + $0x8]] }
  0x51   :  { %v217_v24 = vadd.f32 %v807_v15, %v203_v16  ;;  %v231_v25 = vmul.f32 %v230_v22, %v1044_v0  ;;  %v232_v26 = vmul.f32 %v230_v22, %v1049_v1  ;;  %v1138_v29 = vmax.f32 %v183_v14, 0.0  ;;  %s1275_s6 = sld [smem:[#allocation7 + $0x80]] }
  0x52   :  { %v245_v30 = vmul.f32 %v244_v23, %v1044_v0  ;;  %v246_v31 = vmul.f32 %v244_v23, %v1049_v1  ;;  %v218_v32 = vadd.f32 %v808_v18, %v204_v17  ;;  %v258_v35 = vstv %s1111_s7  ;;  %s1277_s7 = sld [smem:[#allocation7 + $0x81]] }
  0x53   :  { %v812_v33 = vrot.slane %v231_v25, 9  ;;  %v813_v34 = vrot.slane %v232_v26, 9  ;;  %v265_v37 = vmul.f32 %v264_v27, %v1044_v0  ;;  %v268_v38 = vstv %s1119_s8  ;;  %s1281_s8 = sld [smem:[#allocation7 + $0x82]] }
  0x54   :  { %v815_v36 = vrot.slane %v245_v30, 10  ;;  %v282_v39 = vstv %s1121_s9  ;;  %v221_v40 = vadd.f32 %v220_v19, %v217_v24  ;;  %v816_v43 = vrot.slane %v246_v31, 10  ;;  %s1283_s9 = sld [smem:[#allocation7 + $0x83]] }
  0x55   :  { %v241_v41 = vadd.f32 %v812_v33, %v227_v20  ;;  %v242_v42 = vadd.f32 %v813_v34, %v228_v21  ;;  %v269_v44 = vmul.f32 %v268_v38, %v1044_v0  ;;  %v270_v45 = vmul.f32 %v268_v38, %v1049_v1 }
  0x56   :  { %v283_v46 = vmul.f32 %v282_v39, %v1044_v0  ;;  %v284_v47 = vmul.f32 %v282_v39, %v1049_v1  ;;  %v1158_v48 = vmax.f32 %v184_v28, 0.0  ;;  %v266_v50 = vmul.f32 %v264_v27, %v1049_v1 }
  0x57   :  { %v255_v49 = vadd.f32 %v815_v36, %v241_v41  ;;  %v302_v51 = vstv %s1129_s10  ;;  %v222_v52 = vadd.f32 %v220_v19, %v218_v32  ;;  %v820_v53 = vrot.slane %v269_v44, 9  ;;  %s1291_s10 = sld [smem:[#allocation7 + $0x9]] }
  0x58   :  { %v821_v54 = vrot.slane %v270_v45, 9  ;;  %v823_v55 = vrot.slane %v283_v46, 10  ;;  %v1166_v56 = vmax.f32 %v221_v40, 0.0  ;;  %v256_v57 = vadd.f32 %v816_v43, %v242_v42 }
  0x59   :  { %v259_v58 = vadd.f32 %v258_v35, %v255_v49  ;;  %v824_v59 = vrot.slane %v284_v47, 10  ;;  %v279_v60 = vadd.f32 %v820_v53, %v265_v37  ;;  %v303_v61 = vmul.f32 %v302_v51, %v1044_v0 }
  0x5a   :  { %v306_v62 = vstv %s1142_s11  ;;  %v320_v63 = vstv %s1144_s3  ;;  %v280_v2 = vadd.f32 %v821_v54, %v266_v50  ;;  %v304_v3 = vmul.f32 %v302_v51, %v1049_v1  ;;  %s1296_s11 = sld [smem:[#allocation7 + $0x84]]  ;;  %s1298_s3 = sld [smem:[#allocation7 + $0x85]] }
  0x5b   :  { %v307_v6 = vmul.f32 %v306_v62, %v1044_v0  ;;  %v308_v7 = vmul.f32 %v306_v62, %v1049_v1  ;;  %v293_v9 = vadd.f32 %v823_v55, %v279_v60  ;;  %v296_v10 = vstv %s1150_s4  ;;  %s1309_s4 = sld [smem:[#allocation7 + $0x86]] }
  0x5c   :  { %v321_v11 = vmul.f32 %v320_v63, %v1044_v0  ;;  %v322_v13 = vmul.f32 %v320_v63, %v1049_v1  ;;  %v1185_v14 = vmax.f32 %v222_v52, 0.0  ;;  %v340_v17 = vstv %s1152_s12  ;;  %s1315_s12 = sld [smem:[#allocation7 + $0x87]] }
  0x5d   :  { %v828_v15 = vrot.slane %v307_v6, 9  ;;  %v829_v16 = vrot.slane %v308_v7, 9  ;;  %v260_v18 = vadd.f32 %v258_v35, %v256_v57  ;;  %v1190_v19 = vmax.f32 %v259_v58, 0.0 }
  0x5e   :  { %v831_v20 = vrot.slane %v321_v11, 10  ;;  %v832_v21 = vrot.slane %v322_v13, 10  ;;  %v294_v22 = vadd.f32 %v824_v59, %v280_v2  ;;  %v297_v23 = vadd.f32 %v296_v10, %v293_v9 }
  0x5f   :  { %v317_v24 = vadd.f32 %v828_v15, %v303_v61  ;;  %v318_v25 = vadd.f32 %v829_v16, %v304_v3  ;;  %v341_v26 = vmul.f32 %v340_v17, %v1044_v0  ;;  %v342_v27 = vmul.f32 %v340_v17, %v1049_v1 }
  0x60   :  { %v344_v28 = vstv %s1162_s13  ;;  %v358_v30 = vstv %s1164_s14  ;;  %v1200_v35 = vmax.f32 %v260_v18, 0.0  ;;  %v334_v36 = vstv %s1171_s15  ;;  %s1323_s13 = sld [smem:[#allocation7 + $0x88]]  ;;  %s1330_s14 = sld [smem:[#allocation7 + $0x89]] }
  0x61   :  { %v331_v31 = vadd.f32 %v831_v20, %v317_v24  ;;  %v332_v32 = vadd.f32 %v832_v21, %v318_v25  ;;  %v345_v33 = vmul.f32 %v344_v28, %v1044_v0  ;;  %v346_v34 = vmul.f32 %v344_v28, %v1049_v1  ;;  %s1334_s15 = sld [smem:[#allocation7 + $0x100]] }
  0x62   :  { %v359_v37 = vmul.f32 %v358_v30, %v1044_v0  ;;  %v360_v38 = vmul.f32 %v358_v30, %v1049_v1  ;;  %v298_v39 = vadd.f32 %v296_v10, %v294_v22  ;;  %v378_v42 = vstv %s1176_s16  ;;  %s1338_s16 = sld [smem:[#allocation7 + $0x101]] }
  0x63   :  { %v836_v40 = vrot.slane %v345_v33, 9  ;;  %v837_v41 = vrot.slane %v346_v34, 9  ;;  %v1210_v43 = vmax.f32 %v297_v23, 0.0  ;;  %v372_v46 = vstv %s1181_s17  ;;  %s1340_s17 = sld [smem:[#allocation7 + $0x102]] }
  0x64   :  { %v839_v44 = vrot.slane %v359_v37, 10  ;;  %v840_v45 = vrot.slane %v360_v38, 10  ;;  %v335_v47 = vadd.f32 %v334_v36, %v331_v31  ;;  %v336_v49 = vadd.f32 %v334_v36, %v332_v32 }
  0x65   :  { %v355_v50 = vadd.f32 %v836_v40, %v341_v26  ;;  %v356_v51 = vadd.f32 %v837_v41, %v342_v27  ;;  %v379_v52 = vmul.f32 %v378_v42, %v1044_v0  ;;  %v382_v53 = vstv %s1183_s18  ;;  %s1347_s18 = sld [smem:[#allocation7 + $0x103]] }
  0x66   :  { %v396_v54 = vstv %s1188_s19  ;;  %v416_v55 = vstv %s1192_s20  ;;  %v383_v59 = vmul.f32 %v382_v53, %v1044_v0  ;;  %v384_v60 = vmul.f32 %v382_v53, %v1049_v1  ;;  %s1349_s19 = sld [smem:[#allocation7 + $0x104]]  ;;  %s1361_s20 = sld [smem:[#allocation7 + $0x105]] }
  0x67   :  { %v369_v57 = vadd.f32 %v839_v44, %v355_v50  ;;  %v370_v58 = vadd.f32 %v840_v45, %v356_v51  ;;  %v1223_v61 = vmax.f32 %v298_v39, 0.0  ;;  %v380_v62 = vmul.f32 %v378_v42, %v1049_v1 }
  0x68   :  { %v397_v63 = vmul.f32 %v396_v54, %v1044_v0  ;;  %v398_v2 = vmul.f32 %v396_v54, %v1049_v1  ;;  %v1232_v3 = vmax.f32 %v335_v47, 0.0  ;;  %v1234_v6 = vmax.f32 %v336_v49, 0.0 }
  0x69   :  { %v844_v7 = vrot.slane %v383_v59, 9  ;;  %v845_v9 = vrot.slane %v384_v60, 9  ;;  %v373_v10 = vadd.f32 %v372_v46, %v369_v57  ;;  %v417_v11 = vmul.f32 %v416_v55, %v1044_v0 }
  0x6a   :  { %v420_v13 = vstv %s1205_s21  ;;  %v434_v15 = vstv %s1207_s22  ;;  %v374_v16 = vadd.f32 %v372_v46, %v370_v58  ;;  %v847_v18 = vrot.slane %v397_v63, 10  ;;  %s1363_s21 = sld [smem:[#allocation7 + $0x106]]  ;;  %s1365_s22 = sld [smem:[#allocation8]] }
  0x6b   :  { %v393_v17 = vadd.f32 %v844_v7, %v379_v52  ;;  %v848_v20 = vrot.slane %v398_v2, 10  ;;  %v394_v21 = vadd.f32 %v845_v9, %v380_v62  ;;  %v421_v22 = vmul.f32 %v420_v13, %v1044_v0 }
  0x6c   :  { %v422_v23 = vmul.f32 %v420_v13, %v1049_v1  ;;  %v435_v24 = vmul.f32 %v434_v15, %v1044_v0  ;;  %v410_v25 = vstv %s1213_s23  ;;  %v418_v26 = vmul.f32 %v416_v55, %v1049_v1  ;;  %s1373_s23 = sld [smem:[#allocation7 + $0x107]] }
  0x6d   :  { %v436_v27 = vmul.f32 %v434_v15, %v1049_v1  ;;  %v454_v28 = vstv %s1215_s0  ;;  %v1254_v30 = vmax.f32 %v373_v10, 0.0  ;;  %v852_v31 = vrot.slane %v421_v22, 9  ;;  %s1377_s0 = sld [smem:[#allocation8 + $0x1]] }
  0x6e   :  { %v853_v32 = vrot.slane %v422_v23, 9  ;;  %v855_v33 = vrot.slane %v435_v24, 10  ;;  %v1258_v34 = vmax.f32 %v374_v16, 0.0  ;;  %v407_v0 = vadd.f32 %v847_v18, %v393_v17 }
  0x6f   :  { %v455_v36 = vmul.f32 %v454_v28, %v1113_v4  ;;  %v456_v37 = vmul.f32 %v454_v28, %v1115_v5  ;;  %v408_v38 = vadd.f32 %v848_v20, %v394_v21  ;;  %v431_v1 = vadd.f32 %v852_v31, %v417_v11 }
  0x70   :  { %v458_v39 = vstv %s1228_s24  ;;  %v464_v40 = vstv %s1230_s25  ;;  %v856_v41 = vrot.slane %v436_v27, 10  ;;  %v448_v42 = vstv %s1236_s26  ;;  %s1383_s24 = sld [smem:[#allocation7 + $0x108]]  ;;  %s1389_s25 = sld [smem:[#allocation7 + $0x109]] }
  0x71   :  { %v459_v44 = vmul.f32 %v458_v39, %v1123_v8  ;;  %v460_v45 = vmul.f32 %v458_v39, %v1126_v12  ;;  %v432_v46 = vadd.f32 %v853_v32, %v418_v26  ;;  %v445_v47 = vadd.f32 %v855_v33, %v431_v1  ;;  %s888_s26 = sld [smem:[#allocation8 + $0x2]] }
  0x72   :  { %v465_v49 = vmul.f32 %v464_v40, %v1138_v29  ;;  %v466_v50 = vmul.f32 %v464_v40, %v1158_v48  ;;  %v470_v53 = vstv %s1241_s2  ;;  %v476_v54 = vstv %s1243_s27  ;;  %s996_s2 = smov [#allocation10]  }
  0x73   :  { %v461_v51 = vadd.f32 %v459_v44, %v455_v36  ;;  %v462_v52 = vadd.f32 %v460_v45, %v456_v37  ;;  %v411_v55 = vadd.f32 %v410_v25, %v407_v0  ;;  %v412_v57 = vadd.f32 %v410_v25, %v408_v38  ;;  %s769_s27 = sshll.u32 %s996_s2, 4  ;;  %s770_s27 = int_to_ptr.vmem [resolvable:$true] %s769_s27 }
  0x74   :  { %v471_v58 = vmul.f32 %v470_v53, %v1166_v56  ;;  %v472_v59 = vmul.f32 %v470_v53, %v1185_v14  ;;  %v477_v63 = vmul.f32 %v476_v54, %v1190_v19  ;;  %v478_v2 = vmul.f32 %v476_v54, %v1200_v35  ;;  %p965_p7 = scmp.lt.s32.totalorder %s770_s27, %s770_s27 }
  0x75   :  { %v467_v60 = vadd.f32 %v465_v49, %v461_v51  ;;  %v468_v62 = vadd.f32 %v466_v50, %v462_v52  ;;  %v446_v7 = vadd.f32 %v856_v41, %v432_v46  ;;  %v449_v9 = vadd.f32 %v448_v42, %v445_v47 }
  0x76   :  { %v482_v10 = vstv %s1252_s1  ;;  %v488_v11 = vstv %s1256_s28  ;;  %v1293_v18 = vmax.f32 %v411_v55, 0.0  ;;  %v494_v20 = vstv %s1264_s29  ;;  %s960_s1 = scalar_lea.vmem %s770_s27, 256 }
  0x77   :  { %v473_v13 = vadd.f32 %v471_v58, %v467_v60  ;;  %v474_v15 = vadd.f32 %v472_v59, %v468_v62  ;;  %v483_v16 = vmul.f32 %v482_v10, %v1210_v43  ;;  %v484_v17 = vmul.f32 %v482_v10, %v1223_v61  ;;  %p961_p6 = scmp.ne.s32.totalorder %s770_s27, %s960_s1  ;;  %p966_p8 = scmp.lt.s32.totalorder %s960_s1, %s960_s1 }
  0x78   :  { %v489_v23 = vmul.f32 %v488_v11, %v1232_v3  ;;  %v490_v24 = vmul.f32 %v488_v11, %v1234_v6  ;;  %v1302_v25 = vmax.f32 %v412_v57, 0.0  ;;  %v450_v26 = vadd.f32 %v448_v42, %v446_v7 }
  0x79   :  { %v479_v21 = vadd.f32 %v477_v63, %v473_v13  ;;  %v480_v22 = vadd.f32 %v478_v2, %v474_v15  ;;  %v1304_v27 = vmax.f32 %v449_v9, 0.0  ;;  %v500_v28 = vstv %s1271_s30  ;;  %p967_p9 = por %p966_p8, %p965_p7 }
  0x7a   :  { %v495_v33 = vmul.f32 %v494_v20, %v1254_v30  ;;  %v496_v0 = vmul.f32 %v494_v20, %v1258_v34  ;;  %v516_v36 = vstv %s1275_s6  ;;  %v520_v37 = vstv %s1277_s7 }
  0x7b   :  { %v485_v31 = vadd.f32 %v483_v16, %v479_v21  ;;  %v486_v32 = vadd.f32 %v484_v17, %v480_v22  ;;  %v526_v38 = vstv %s1281_s8  ;;  %v532_v1 = vstv %s1283_s9  ;;  %p968_p10 = pnand %p967_p9, %p961_p6 }
  0x7c   :  { %v517_v41 = vmul.f32 %v516_v36, %v1113_v4  ;;  %v518_v42 = vmul.f32 %v516_v36, %v1115_v5  ;;  %v521_v44 = vmul.f32 %v520_v37, %v1123_v8  ;;  %v522_v45 = vmul.f32 %v520_v37, %v1126_v12 }
  0x7d   :  { %v491_v39 = vadd.f32 %v489_v23, %v485_v31  ;;  %v492_v40 = vadd.f32 %v490_v24, %v486_v32  ;;  %v527_v46 = vmul.f32 %v526_v38, %v1138_v29  ;;  %v528_v47 = vmul.f32 %v526_v38, %v1158_v48 }
  0x7e   :  { %v1325_v49 = vmax.f32 %v450_v26, 0.0  ;;  %v506_v50 = vstv %s1291_s10  ;;  %v533_v51 = vmul.f32 %v532_v1, %v1166_v56  ;;  %v534_v52 = vmul.f32 %v532_v1, %v1185_v14 }
  0x7f   :  { %v523_v53 = vadd.f32 %v521_v44, %v517_v41  ;;  %v524_v54 = vadd.f32 %v522_v45, %v518_v42  ;;  %v538_v55 = vstv %s1296_s11  ;;  %v544_v57 = vstv %s1298_s3 }
  0x80   :  { %v497_v58 = vadd.f32 %v495_v33, %v491_v39  ;;  %v498_v59 = vadd.f32 %v496_v0, %v492_v40  ;;  %v501_v60 = vmul.f32 %v500_v28, %v1293_v18  ;;  %v502_v62 = vmul.f32 %v500_v28, %v1302_v25 }
  0x81   :  { %v529_v63 = vadd.f32 %v527_v46, %v523_v53  ;;  %v530_v2 = vadd.f32 %v528_v47, %v524_v54  ;;  %v539_v7 = vmul.f32 %v538_v55, %v1190_v19  ;;  %v540_v9 = vmul.f32 %v538_v55, %v1200_v35 }
  0x82   :  { %v507_v10 = vmul.f32 %v506_v50, %v1304_v27  ;;  %v545_v11 = vmul.f32 %v544_v57, %v1210_v43  ;;  %v550_v13 = vstv %s1309_s4  ;;  %v546_v17 = vmul.f32 %v544_v57, %v1223_v61 }
  0x83   :  { %v535_v15 = vadd.f32 %v533_v51, %v529_v63  ;;  %v536_v16 = vadd.f32 %v534_v52, %v530_v2  ;;  %v556_v20 = vstv %s1315_s12  ;;  %v503_v21 = vadd.f32 %v501_v60, %v497_v58 }
  0x84   :  { %v504_v22 = vadd.f32 %v502_v62, %v498_v59  ;;  %v508_v23 = vmul.f32 %v506_v50, %v1325_v49  ;;  %v551_v24 = vmul.f32 %v550_v13, %v1232_v3  ;;  %v552_v31 = vmul.f32 %v550_v13, %v1234_v6 }
  0x85   :  { %v541_v26 = vadd.f32 %v539_v7, %v535_v15  ;;  %v542_v28 = vadd.f32 %v540_v9, %v536_v16  ;;  %v562_v32 = vstv %s1323_s13  ;;  %v557_v33 = vmul.f32 %v556_v20, %v1254_v30 }
  0x86   :  { %v558_v0 = vmul.f32 %v556_v20, %v1258_v34  ;;  %v563_v36 = vmul.f32 %v562_v32, %v1293_v18  ;;  %v568_v37 = vstv %s1330_s14  ;;  %v564_v39 = vmul.f32 %v562_v32, %v1302_v25 }
  0x87   :  { %v547_v38 = vadd.f32 %v545_v11, %v541_v26  ;;  %v548_v1 = vadd.f32 %v546_v17, %v542_v28  ;;  %v578_v40 = vstv %s1334_s15  ;;  %v582_v44 = vstv %s1338_s16 }
  0x88   :  { %v579_v41 = vmul.f32 %v578_v40, %v1113_v4  ;;  %v580_v42 = vmul.f32 %v578_v40, %v1115_v5  ;;  %v588_v45 = vstv %s1340_s17  ;;  %v583_v50 = vmul.f32 %v582_v44, %v1123_v8 }
  0x89   :  { %v553_v46 = vadd.f32 %v551_v24, %v547_v38  ;;  %v554_v47 = vadd.f32 %v552_v31, %v548_v1  ;;  %v584_v51 = vmul.f32 %v582_v44, %v1126_v12  ;;  %v589_v52 = vmul.f32 %v588_v45, %v1138_v29 }
  0x8a   :  { %v590_v53 = vmul.f32 %v588_v45, %v1158_v48  ;;  %v594_v54 = vstv %s1347_s18  ;;  %v600_v4 = vstv %s1349_s19  ;;  %v585_v57 = vadd.f32 %v583_v50, %v579_v41 }
  0x8b   :  { %v559_v5 = vadd.f32 %v557_v33, %v553_v46  ;;  %v560_v55 = vadd.f32 %v558_v0, %v554_v47  ;;  %v586_v58 = vadd.f32 %v584_v51, %v580_v42  ;;  %v569_v8 = vmul.f32 %v568_v37, %v1304_v27 }
  0x8c   :  { %v570_v12 = vmul.f32 %v568_v37, %v1325_v49  ;;  %v595_v59 = vmul.f32 %v594_v54, %v1166_v56  ;;  %v596_v29 = vmul.f32 %v594_v54, %v1185_v14  ;;  %v591_v48 = vadd.f32 %v589_v52, %v585_v57 }
  0x8d   :  { %v592_v60 = vadd.f32 %v590_v53, %v586_v58  ;;  %v601_v62 = vmul.f32 %v600_v4, %v1190_v19  ;;  %v602_v63 = vmul.f32 %v600_v4, %v1200_v35  ;;  %v565_v2 = vadd.f32 %v563_v36, %v559_v5 }
  0x8e   :  { %v566_v7 = vadd.f32 %v564_v39, %v560_v55  ;;  %v606_v9 = vstv %s1361_s20  ;;  %v612_v11 = vstv %s1363_s21  ;;  %v509_v13 = vadd.f32 %v507_v10, %v503_v21 }
  0x8f   :  { %v512_v15 = vstv %s1365_s22  ;;  %v597_v56 = vadd.f32 %v595_v59, %v591_v48  ;;  %v598_v16 = vadd.f32 %v596_v29, %v592_v60  ;;  %v510_v14 = vadd.f32 %v508_v23, %v504_v22 }
  0x90   :  { %v607_v17 = vmul.f32 %v606_v9, %v1210_v43  ;;  %v608_v20 = vmul.f32 %v606_v9, %v1223_v61  ;;  %v618_v24 = vstv %s1373_s23  ;;  %v613_v35 = vmul.f32 %v612_v11, %v1232_v3 }
  0x91   :  { %v603_v19 = vadd.f32 %v601_v62, %v597_v56  ;;  %v604_v26 = vadd.f32 %v602_v63, %v598_v16  ;;  %v614_v28 = vmul.f32 %v612_v11, %v1234_v6  ;;  %v571_v31 = vadd.f32 %v569_v8, %v565_v2 }
  0x92   :  { %v572_v32 = vadd.f32 %v570_v12, %v566_v7  ;;  %v574_v33 = vstv %s1377_s0  ;;  %v624_v10 = vstv %s1383_s24  ;;  %v619_v22 = vmul.f32 %v618_v24, %v1254_v30 }
  0x93   :  { %v609_v21 = vadd.f32 %v607_v17, %v603_v19  ;;  %v610_v0 = vadd.f32 %v608_v20, %v604_v26  ;;  %v620_v43 = vmul.f32 %v618_v24, %v1258_v34  ;;  %v630_v23 = vstv %s1389_s25 }
  0x94   :  { %v625_v37 = vmul.f32 %v624_v10, %v1293_v18  ;;  %v626_v3 = vmul.f32 %v624_v10, %v1302_v25  ;;  %v513_v38 = vadd.f32 %v512_v15, %v509_v13  ;;  %v514_v6 = vadd.f32 %v512_v15, %v510_v14 }
  0x95   :  { %v615_v61 = vadd.f32 %v613_v35, %v609_v21  ;;  %v616_v36 = vadd.f32 %v614_v28, %v610_v0  ;;  %v575_v1 = vadd.f32 %v574_v33, %v571_v31  ;;  %v576_v39 = vadd.f32 %v574_v33, %v572_v32 }
  0x96   :  { %v631_v42 = vmul.f32 %v630_v23, %v1304_v27  ;;  %v632_v44 = vmul.f32 %v630_v23, %v1325_v49  ;;  %v636_v34 = vstv %s888_s26  ;;  %v679_v56 = vlaneseq }
  0x97   :  { %v621_v40 = vadd.f32 %v619_v22, %v615_v61  ;;  %v622_v41 = vadd.f32 %v620_v43, %v616_v36  ;;  %v639_v50 = vmax.f32 %v513_v38, %v575_v1  ;;  %v640_v51 = vmax.f32 %v514_v6, %v576_v39 }
  0x98   :  { %v680_v16 = vshrl.u32 %v679_v56, 7 }
  0x99   :  { %v627_v30 = vadd.f32 %v625_v37, %v621_v40  ;;  %v628_v45 = vadd.f32 %v626_v3, %v622_v41 }
  0x9a   :  { %v681_v26 = vsub.s32 0, %v680_v16  ;;  %v685_v35 = vsub.s32 4, %v680_v16 }
  0x9b   :  { %v633_v46 = vadd.f32 %v631_v42, %v627_v30  ;;  %v634_v47 = vadd.f32 %v632_v44, %v628_v45 }
  0x9d   :  { %v637_v18 = vadd.f32 %v636_v34, %v633_v46  ;;  %v638_v52 = vadd.f32 %v636_v34, %v634_v47 }
  0x9f   :  { %v641_v25 = vmax.f32 %v639_v50, %v637_v18  ;;  %v642_v53 = vmax.f32 %v640_v51, %v638_v52 }
  0xa1   :  { %v643_v54 = vsub.f32 %v513_v38, %v641_v25  ;;  %v644_v4 = vsub.f32 %v514_v6, %v642_v53  ;;  %v649_v5 = vsub.f32 %v575_v1, %v641_v25  ;;  %v650_v55 = vsub.f32 %v576_v39, %v642_v53 }
  0xa2   :  { %v657_v57 = vsub.f32 %v637_v18, %v641_v25  ;;  %v658_v58 = vsub.f32 %v638_v52, %v642_v53 }
  0xa3   :  { %v645_v27 = vmul.f32 1.442695, %v643_v54  ;;  %v647_v8 = vmul.f32 1.442695, %v644_v4  ;;  %v651_v49 = vmul.f32 1.442695, %v649_v5 }
  0xa4   :  { %v653_v12 = vmul.f32 1.442695, %v650_v55  ;;  %v659_v59 = vmul.f32 1.442695, %v657_v57  ;;  %v661_v29 = vmul.f32 1.442695, %v658_v58 }
  0xa5   :  { %896 = vpow2.f32 %v645_v27 }
  0xa6   :  { %898 = vpow2.f32 %v647_v8 }
  0xa7   :  { %900 = vpow2.f32 %v651_v49 }
  0xa8   :  { %902 = vpow2.f32 %v653_v12 }
  0xa9   :  { %904 = vpow2.f32 %v659_v59 }
  0xaa   :  { %906 = vpow2.f32 %v661_v29 }
  0xaf   :  { %v897_v48 = vpop.eup %896 }
  0xb0   :  { %v899_v60 = vpop.eup %898 }
  0xb1   :  { %v901_v62 = vpop.eup %900 }
  0xb2   :  { %v903_v63 = vpop.eup %902  ;;  %v655_v2 = vadd.f32 %v901_v62, %v897_v48 }
  0xb3   :  { %v905_v7 = vpop.eup %904  ;;  %v656_v9 = vadd.f32 %v903_v63, %v899_v60 }
  0xb4   :  { %v907_v11 = vpop.eup %906  ;;  %v663_v13 = vadd.f32 %v905_v7, %v655_v2 }
  0xb5   :  { %v664_v15 = vadd.f32 %v907_v11, %v656_v9 }
  0xb6   :  { %908 = vlog2.f32 %v663_v13 }
  0xb7   :  { %910 = vlog2.f32 %v664_v15 }
  0xc0   :  { %v909_v14 = vpop.eup %908 }
  0xc1   :  { %v911_v17 = vpop.eup %910  ;;  %v666_v20 = vmul.f32 0.6931472, %v909_v14 }
  0xc2   :  { %v668_v24 = vmul.f32 0.6931472, %v911_v17 }
  0xc3   :  { %v669_v19 = vadd.f32 %v666_v20, %v641_v25 }
  0xc4   :  { %v670_v28 = vadd.f32 %v668_v24, %v642_v53 }
  0xc5   :  { %v671_v31 = vsub.f32 %v513_v38, %v669_v19  ;;  %v673_v32 = vsub.f32 %v575_v1, %v669_v19  ;;  %v675_v33 = vsub.f32 %v637_v18, %v669_v19 }
  0xc6   :  { %v672_v10 = vsub.f32 %v514_v6, %v670_v28  ;;  %v674_v21 = vsub.f32 %v576_v39, %v670_v28  ;;  %v676_v0 = vsub.f32 %v638_v52, %v670_v28 }
  0xc7   :  { %v682_v22 = vrot.slane %v671_v31, %v681_v26  ;;  %v686_v43 = vrot.slane %v671_v31, %v685_v35  ;;  %v704_v23 = vrot.slane %v673_v32, %v681_v26  ;;  %v708_v61 = vrot.slane %v673_v32, %v685_v35 }
  0xc8   :  { %v690_v36 = vrot.slane %v672_v10, %v681_v26  ;;  %v694_v37 = vrot.slane %v672_v10, %v685_v35  ;;  %v712_v3 = vrot.slane %v674_v21, %v681_v26  ;;  %v716_v40 = vrot.slane %v674_v21, %v685_v35 }
  0xc9   :  { %v726_v41 = vrot.slane %v675_v33, %v681_v26  ;;  %v730_v42 = vrot.slane %v675_v33, %v685_v35  ;;  %v734_v44 = vrot.slane %v676_v0, %v681_v26  ;;  %v738_v30 = vrot.slane %v676_v0, %v685_v35 }
  0xca   :  { %v744_v38 = vsel %vm743_vm0, %v682_v22, %v704_v23  ;;  %v745_v6 = vsel %vm743_vm0, %v686_v43, %v708_v61  ;;  %v746_v1 = vsel %vm743_vm0, %v690_v36, %v712_v3  ;;  %v747_v39 = vsel %vm743_vm0, %v694_v37, %v716_v40 }
  0xcb   :  { %v749_v45 = vsel %vm748_vm1, %v744_v38, %v726_v41  ;;  %v750_v34 = vsel %vm748_vm1, %v745_v6, %v730_v42  ;;  %v751_v46 = vsel %vm748_vm1, %v746_v1, %v734_v44  ;;  %v752_v47 = vsel %vm748_vm1, %v747_v39, %v738_v30 }
  0xcc   :  { %v757_v50 = vcombine.low %v749_v45, %v750_v34  ;;  %v758_v51 = vcombine.low %v751_v46, %v752_v47 }
  0xce   :  { %761 = vst [vmem:[#allocation10] sm:$0x77] %v757_v50  ;;  %762 = vst [vmem:[#allocation10 + $0x8] sm:$0x77] %v758_v51 }
  0xcf   :  { %971 = shalt.err (!%p968_p10)
}
  0xd0   :  { %s972_s30 = scalar_lea.hbm %s1435_s5, 256 }
  0xd1   :  { %p973_p11 = scmp.ne.s32.totalorder %s1435_s5, %s972_s30  ;;  %p976_p12 = scmp.lt.u32.totalorder %s972_s30, %s1435_s5 }
  0xd3   :  { %p978_p13 = pnand %p976_p12, %p973_p11 }
  0xd5   :  { %981 = shalt.err (!%p978_p13)
}
  0xd6   :  { %772 = dma.vmem_to_hbm [thread:$0]  %s770_s27, 256, %s1435_s5, [#allocation3]  }
  0xd7   :  { %988 = dma.done.wait [#allocation3], 256  }
  0xd8   :  { %989 = vsyncadd [#allocation3], 4294967040 }
  0xd9   :  { %776 = vsyncpa [#allocation3], 1 }
  0xda   :  { %777 = vsyncpa [#allocation4], 1 }
  0xdb   :  { %778 = vsyncpa [#allocation6], 1 }
  0xdc   :  { %779 = vsyncpa [#allocation9], 1 }

</bundles_post_ra>
